<compile_context>
chip_gen: v7x
topology: tpu7x:2x2x1
jax: 0.10.0
libtpu: 0.0.40
codegen_flags: <defaults>
</compile_context>

<pallas_src>
import functools

import jax
import jax.numpy as jnp
import numpy as np
from jax import lax
from jax.experimental import pallas as pl
from jax.experimental.pallas import tpu as pltpu


# ------------------------------ fused kernel --------------------------------


def _fused_kernel(ct_ref, pet_ref, wq_ref, bq_ref, wk_ref, bk_ref,
                  wv_ref, bv_ref, wo_ref, bo_ref, o_ref, *, S, H, d):
    """One batch per grid step: ct/pet refs are (S, E) row blocks."""
    E = H * d
    ct = ct_ref[...]
    pet = pet_ref[...]

    # Fused projections (scale already folded into wq/bq).
    q = jnp.dot(ct, wq_ref[...], preferred_element_type=jnp.float32) + bq_ref[...]
    k = jnp.dot(ct, wk_ref[...], preferred_element_type=jnp.float32) + bk_ref[...]
    v = jnp.dot(pet, wv_ref[...], preferred_element_type=jnp.float32) + bv_ref[...]

    # Per-head attention; head merge is folded into the output projection by
    # accumulating head_out @ Wo[h*d:(h+1)*d, :]  (unrolled, H is small).
    o_acc = jnp.zeros((S, E), jnp.float32)
    for h in range(H):
        lo = h * d
        qh = q[:, lo:lo + d]                       # (S, d)
        kh = k[:, lo:lo + d]
        vh = v[:, lo:lo + d]
        # scores = qh @ kh^T without materializing a transpose.
        s = lax.dot_general(qh, kh, (((1,), (1,)), ((), ())),
                            preferred_element_type=jnp.float32)   # (S, S)
        m = jnp.max(s, axis=-1, keepdims=True)
        p = jnp.exp(s - m)
        denom = jnp.sum(p, axis=-1, keepdims=True)
        p = p * pl.reciprocal(denom, approx=True)
        head_out = jnp.dot(p, vh, preferred_element_type=jnp.float32)  # (S, d)
        o_acc = o_acc + jnp.dot(head_out, wo_ref[lo:lo + d, :],
                                preferred_element_type=jnp.float32)

    o_ref[...] = (o_acc + bo_ref[...]).astype(o_ref.dtype)


# --------------------------- module forward pass ----------------------------


def cross_attention_fusion(pet_features, ct_features, params, num_heads):
    """Mirrors CrossAttentionFusion.forward for (S, B, E) inputs."""
    S, B, E = ct_features.shape
    H = num_heads
    d = E // H
    scale = 1.0 / float(np.sqrt(d))

    in_w, in_b = params["in_w"], params["in_b"]
    wq_in, wk_in, wv_in = in_w[:E], in_w[E:2 * E], in_w[2 * E:]
    bq_in, bk_in, bv_in = in_b[:E], in_b[E:2 * E], in_b[2 * E:]

    # Algebraic weight fusion (done once per call on tiny (E,E) params, off
    # the hot path), stored pre-transposed so the kernel computes x @ W.
    wq_f = ((wq_in @ params["wq"]) * scale).T                         # (E, E)
    bq_f = ((wq_in @ params["bq"] + bq_in) * scale).reshape(1, E)
    wk_f = (wk_in @ params["wk"]).T
    bk_f = (wk_in @ params["bk"] + bk_in).reshape(1, E)
    wv_f = (wv_in @ params["wv"]).T
    bv_f = (wv_in @ params["bv"] + bv_in).reshape(1, E)
    wo_f = (params["out_w"] @ params["mo_w"]).T
    bo_f = (params["out_w"] @ params["mo_b"] + params["out_b"]).reshape(1, E)

    # (S, B, E) -> batch-major (B*S, E): per-batch rows are contiguous blocks.
    ct2 = ct_features.transpose(1, 0, 2).reshape(B * S, E)
    pet2 = pet_features.transpose(1, 0, 2).reshape(B * S, E)

    kernel = functools.partial(_fused_kernel, S=S, H=H, d=d)
    row_spec = pl.BlockSpec((S, E), lambda b: (b, 0))
    w_spec = pl.BlockSpec((E, E), lambda b: (0, 0))
    b_spec = pl.BlockSpec((1, E), lambda b: (0, 0))

    out = pl.pallas_call(
        kernel,
        out_shape=jax.ShapeDtypeStruct((B * S, E), ct_features.dtype),
        grid=(B,),
        in_specs=[row_spec, row_spec,
                  w_spec, b_spec, w_spec, b_spec, w_spec, b_spec,
                  w_spec, b_spec],
        out_specs=row_spec,
        compiler_params=pltpu.CompilerParams(
            dimension_semantics=("parallel",)),
    )(ct2, pet2, wq_f, bq_f, wk_f, bk_f, wv_f, bv_f, wo_f, bo_f)

    # TODO(synk): final output last dim is E=32 (<128 lanes) so stores are
    # masked; lane-padding is not worth a post-kernel slice at this size.
    return out.reshape(B, S, E).transpose(1, 0, 2)


# ------------------------------ pure-JAX ref ---------------------------------
# Un-fused reference matching the original PyTorch module, used to validate
# the algebraic weight fusion and the in-kernel attention.


def reference(pet_features, ct_features, params, num_heads):
    S, B, E = ct_features.shape
    H = num_heads
    d = E // H

    def lin(x, w, b):
        return x @ w.T + b

    Q = lin(ct_features, params["wq"], params["bq"])
    K = lin(ct_features, params["wk"], params["bk"])
    V = lin(pet_features, params["wv"], params["bv"])

    in_w, in_b = params["in_w"], params["in_b"]
    q = lin(Q, in_w[:E], in_b[:E])
    k = lin(K, in_w[E:2 * E], in_b[E:2 * E])
    v = lin(V, in_w[2 * E:], in_b[2 * E:])

    qh = q.reshape(S, B, H, d).transpose(1, 2, 0, 3)
    kh = k.reshape(S, B, H, d).transpose(1, 2, 0, 3)
    vh = v.reshape(S, B, H, d).transpose(1, 2, 0, 3)

    s = jnp.einsum("bhqd,bhkd->bhqk", qh, kh) / jnp.sqrt(jnp.float32(d))
    a = jax.nn.softmax(s, axis=-1)
    o = jnp.einsum("bhqk,bhkd->bhqd", a, vh)
    o = o.transpose(2, 0, 1, 3).reshape(S, B, E)

    o = lin(o, params["mo_w"], params["mo_b"])
    return lin(o, params["out_w"], params["out_b"])


# ---------------------------------- main -------------------------------------


def make_params(key, embed_dim):
    E = embed_dim
    ks = jax.random.split(key, 12)
    std = 0.05
    return {
        "wq": jax.random.normal(ks[0], (E, E), jnp.float32) * std,
        "bq": jax.random.normal(ks[1], (E,), jnp.float32) * std,
        "wk": jax.random.normal(ks[2], (E, E), jnp.float32) * std,
        "bk": jax.random.normal(ks[3], (E,), jnp.float32) * std,
        "wv": jax.random.normal(ks[4], (E, E), jnp.float32) * std,
        "bv": jax.random.normal(ks[5], (E,), jnp.float32) * std,
        "in_w": jax.random.normal(ks[6], (3 * E, E), jnp.float32) * std,
        "in_b": jax.random.normal(ks[7], (3 * E,), jnp.float32) * std,
        "mo_w": jax.random.normal(ks[8], (E, E), jnp.float32) * std,
        "mo_b": jax.random.normal(ks[9], (E,), jnp.float32) * std,
        "out_w": jax.random.normal(ks[10], (E, E), jnp.float32) * std,
        "out_b": jax.random.normal(ks[11], (E,), jnp.float32) * std,
    }


if __name__ == "__main__":
    embed_dim, num_heads = 32, 4
    seq, batch = 8, 2

    key = jax.random.PRNGKey(0)
    k_pet, k_ct, k_param = jax.random.split(key, 3)
    pet = jax.random.normal(k_pet, (seq, batch, embed_dim), jnp.float32)
    ct = jax.random.normal(k_ct, (seq, batch, embed_dim), jnp.float32)
    params = make_params(k_param, embed_dim)

    out = jax.block_until_ready(
        cross_attention_fusion(pet, ct, params, num_heads))
    ref = jax.block_until_ready(reference(pet, ct, params, num_heads))

    # Tolerance accounts for the approximate (EUP) softmax reciprocal.
    np.testing.assert_allclose(np.asarray(out), np.asarray(ref),
                               rtol=5e-3, atol=5e-3)
    print("KERNEL_OK")
</pallas_src>

<mosaic_0001>
module attributes {stable_mosaic.version = 11 : i64} {
  func.func @_fused_kernel(%arg0: i32, %arg1: memref<8x32xf32, #tpu.memory_space<vmem>>, %arg2: memref<8x32xf32, #tpu.memory_space<vmem>>, %arg3: memref<32x32xf32, #tpu.memory_space<vmem>>, %arg4: memref<1x32xf32, #tpu.memory_space<vmem>>, %arg5: memref<32x32xf32, #tpu.memory_space<vmem>>, %arg6: memref<1x32xf32, #tpu.memory_space<vmem>>, %arg7: memref<32x32xf32, #tpu.memory_space<vmem>>, %arg8: memref<1x32xf32, #tpu.memory_space<vmem>>, %arg9: memref<32x32xf32, #tpu.memory_space<vmem>>, %arg10: memref<1x32xf32, #tpu.memory_space<vmem>>, %arg11: memref<8x32xf32, #tpu.memory_space<vmem>>) attributes {dimension_semantics = [#tpu.dimension_semantics<parallel>], iteration_bounds = array<i64: 2>, scalar_prefetch = 0 : i64, scratch_operands = 0 : i64, tpu.core_type = #tpu.core_type<tc>, window_params = [{transform_indices = @transform_0, window_bounds = array<i64: 8, 32>}, {transform_indices = @transform_1, window_bounds = array<i64: 8, 32>}, {pipeline_mode = #tpu.pipeline_mode<synchronous>, transform_indices = @transform_2, window_bounds = array<i64: 32, 32>}, {pipeline_mode = #tpu.pipeline_mode<synchronous>, transform_indices = @transform_3, window_bounds = array<i64: 1, 32>}, {pipeline_mode = #tpu.pipeline_mode<synchronous>, transform_indices = @transform_4, window_bounds = array<i64: 32, 32>}, {pipeline_mode = #tpu.pipeline_mode<synchronous>, transform_indices = @transform_5, window_bounds = array<i64: 1, 32>}, {pipeline_mode = #tpu.pipeline_mode<synchronous>, transform_indices = @transform_6, window_bounds = array<i64: 32, 32>}, {pipeline_mode = #tpu.pipeline_mode<synchronous>, transform_indices = @transform_7, window_bounds = array<i64: 1, 32>}, {pipeline_mode = #tpu.pipeline_mode<synchronous>, transform_indices = @transform_8, window_bounds = array<i64: 32, 32>}, {pipeline_mode = #tpu.pipeline_mode<synchronous>, transform_indices = @transform_9, window_bounds = array<i64: 1, 32>}, {transform_indices = @transform_10, window_bounds = array<i64: 8, 32>}]} {
    %c0 = arith.constant 0 : index
    %c0_0 = arith.constant 0 : index
    %0 = vector.load %arg1[%c0, %c0_0] : memref<8x32xf32, #tpu.memory_space<vmem>>, vector<8x32xf32>
    %c0_1 = arith.constant 0 : index
    %c0_2 = arith.constant 0 : index
    %1 = vector.load %arg2[%c0_1, %c0_2] : memref<8x32xf32, #tpu.memory_space<vmem>>, vector<8x32xf32>
    %c0_3 = arith.constant 0 : index
    %c0_4 = arith.constant 0 : index
    %2 = vector.load %arg3[%c0_3, %c0_4] : memref<32x32xf32, #tpu.memory_space<vmem>>, vector<32x32xf32>
    %cst = arith.constant dense<0.000000e+00> : vector<8x32xf32>
    %3 = tpu.matmul %0, %2, %cst {dimension_numbers = #tpu.dot_dimension_numbers<[1], [0], [0], [1], [0, 0, 1, 1], [], []>} : vector<8x32xf32>, vector<32x32xf32>, vector<8x32xf32> -> vector<8x32xf32>
    %c0_5 = arith.constant 0 : index
    %c0_6 = arith.constant 0 : index
    %4 = vector.load %arg4[%c0_5, %c0_6] : memref<1x32xf32, #tpu.memory_space<vmem>>, vector<1x32xf32>
    %5 = vector.broadcast %4 : vector<1x32xf32> to vector<8x32xf32>
    %6 = arith.addf %3, %5 : vector<8x32xf32>
    %c0_7 = arith.constant 0 : index
    %c0_8 = arith.constant 0 : index
    %7 = vector.load %arg5[%c0_7, %c0_8] : memref<32x32xf32, #tpu.memory_space<vmem>>, vector<32x32xf32>
    %cst_9 = arith.constant dense<0.000000e+00> : vector<8x32xf32>
    %8 = tpu.matmul %0, %7, %cst_9 {dimension_numbers = #tpu.dot_dimension_numbers<[1], [0], [0], [1], [0, 0, 1, 1], [], []>} : vector<8x32xf32>, vector<32x32xf32>, vector<8x32xf32> -> vector<8x32xf32>
    %c0_10 = arith.constant 0 : index
    %c0_11 = arith.constant 0 : index
    %9 = vector.load %arg6[%c0_10, %c0_11] : memref<1x32xf32, #tpu.memory_space<vmem>>, vector<1x32xf32>
    %10 = vector.broadcast %9 : vector<1x32xf32> to vector<8x32xf32>
    %11 = arith.addf %8, %10 : vector<8x32xf32>
    %c0_12 = arith.constant 0 : index
    %c0_13 = arith.constant 0 : index
    %12 = vector.load %arg7[%c0_12, %c0_13] : memref<32x32xf32, #tpu.memory_space<vmem>>, vector<32x32xf32>
    %cst_14 = arith.constant dense<0.000000e+00> : vector<8x32xf32>
    %13 = tpu.matmul %1, %12, %cst_14 {dimension_numbers = #tpu.dot_dimension_numbers<[1], [0], [0], [1], [0, 0, 1, 1], [], []>} : vector<8x32xf32>, vector<32x32xf32>, vector<8x32xf32> -> vector<8x32xf32>
    %c0_15 = arith.constant 0 : index
    %c0_16 = arith.constant 0 : index
    %14 = vector.load %arg8[%c0_15, %c0_16] : memref<1x32xf32, #tpu.memory_space<vmem>>, vector<1x32xf32>
    %15 = vector.broadcast %14 : vector<1x32xf32> to vector<8x32xf32>
    %16 = arith.addf %13, %15 : vector<8x32xf32>
    %cst_17 = arith.constant 0.000000e+00 : f32
    %17 = vector.broadcast %cst_17 : f32 to vector<8x32xf32>
    %18 = vector.extract_strided_slice %6 {offsets = [0, 0], sizes = [8, 8], strides = [1, 1]} : vector<8x32xf32> to vector<8x8xf32>
    %19 = vector.extract_strided_slice %11 {offsets = [0, 0], sizes = [8, 8], strides = [1, 1]} : vector<8x32xf32> to vector<8x8xf32>
    %20 = vector.extract_strided_slice %16 {offsets = [0, 0], sizes = [8, 8], strides = [1, 1]} : vector<8x32xf32> to vector<8x8xf32>
    %cst_18 = arith.constant dense<0.000000e+00> : vector<8x8xf32>
    %21 = tpu.matmul %18, %19, %cst_18 {dimension_numbers = #tpu.dot_dimension_numbers<[1], [1], [0], [0], [0, 0, 1, 0], [], []>} : vector<8x8xf32>, vector<8x8xf32>, vector<8x8xf32> -> vector<8x8xf32>
    %cst_19 = arith.constant dense<0xFF800000> : vector<8xf32>
    %22 = vector.multi_reduction <maximumf>, %21, %cst_19 [1] : vector<8x8xf32> to vector<8xf32>
    %23 = vector.shape_cast %22 : vector<8xf32> to vector<8x1xf32>
    %24 = vector.broadcast %23 : vector<8x1xf32> to vector<8x8xf32>
    %25 = arith.subf %21, %24 : vector<8x8xf32>
    %26 = math.exp %25 : vector<8x8xf32>
    %cst_20 = arith.constant dense<0.000000e+00> : vector<8xf32>
    %27 = vector.multi_reduction <add>, %26, %cst_20 [1] : vector<8x8xf32> to vector<8xf32>
    %28 = vector.shape_cast %27 : vector<8xf32> to vector<8x1xf32>
    %29 = tpu.reciprocal %28 {approx = true} : vector<8x1xf32> -> vector<8x1xf32>
    %30 = vector.broadcast %29 : vector<8x1xf32> to vector<8x8xf32>
    %31 = arith.mulf %26, %30 : vector<8x8xf32>
    %cst_21 = arith.constant dense<0.000000e+00> : vector<8x8xf32>
    %32 = tpu.matmul %31, %20, %cst_21 {dimension_numbers = #tpu.dot_dimension_numbers<[1], [0], [0], [1], [0, 0, 1, 1], [], []>} : vector<8x8xf32>, vector<8x8xf32>, vector<8x8xf32> -> vector<8x8xf32>
    %c0_22 = arith.constant 0 : index
    %c0_23 = arith.constant 0 : index
    %33 = vector.load %arg9[%c0_22, %c0_23] : memref<32x32xf32, #tpu.memory_space<vmem>>, vector<8x32xf32>
    %cst_24 = arith.constant dense<0.000000e+00> : vector<8x32xf32>
    %34 = tpu.matmul %32, %33, %cst_24 {dimension_numbers = #tpu.dot_dimension_numbers<[1], [0], [0], [1], [0, 0, 1, 1], [], []>} : vector<8x8xf32>, vector<8x32xf32>, vector<8x32xf32> -> vector<8x32xf32>
    %35 = arith.addf %17, %34 : vector<8x32xf32>
    %36 = vector.extract_strided_slice %6 {offsets = [0, 8], sizes = [8, 8], strides = [1, 1]} : vector<8x32xf32> to vector<8x8xf32>
    %37 = vector.extract_strided_slice %11 {offsets = [0, 8], sizes = [8, 8], strides = [1, 1]} : vector<8x32xf32> to vector<8x8xf32>
    %38 = vector.extract_strided_slice %16 {offsets = [0, 8], sizes = [8, 8], strides = [1, 1]} : vector<8x32xf32> to vector<8x8xf32>
    %cst_25 = arith.constant dense<0.000000e+00> : vector<8x8xf32>
    %39 = tpu.matmul %36, %37, %cst_25 {dimension_numbers = #tpu.dot_dimension_numbers<[1], [1], [0], [0], [0, 0, 1, 0], [], []>} : vector<8x8xf32>, vector<8x8xf32>, vector<8x8xf32> -> vector<8x8xf32>
    %cst_26 = arith.constant dense<0xFF800000> : vector<8xf32>
    %40 = vector.multi_reduction <maximumf>, %39, %cst_26 [1] : vector<8x8xf32> to vector<8xf32>
    %41 = vector.shape_cast %40 : vector<8xf32> to vector<8x1xf32>
    %42 = vector.broadcast %41 : vector<8x1xf32> to vector<8x8xf32>
    %43 = arith.subf %39, %42 : vector<8x8xf32>
    %44 = math.exp %43 : vector<8x8xf32>
    %cst_27 = arith.constant dense<0.000000e+00> : vector<8xf32>
    %45 = vector.multi_reduction <add>, %44, %cst_27 [1] : vector<8x8xf32> to vector<8xf32>
    %46 = vector.shape_cast %45 : vector<8xf32> to vector<8x1xf32>
    %47 = tpu.reciprocal %46 {approx = true} : vector<8x1xf32> -> vector<8x1xf32>
    %48 = vector.broadcast %47 : vector<8x1xf32> to vector<8x8xf32>
    %49 = arith.mulf %44, %48 : vector<8x8xf32>
    %cst_28 = arith.constant dense<0.000000e+00> : vector<8x8xf32>
    %50 = tpu.matmul %49, %38, %cst_28 {dimension_numbers = #tpu.dot_dimension_numbers<[1], [0], [0], [1], [0, 0, 1, 1], [], []>} : vector<8x8xf32>, vector<8x8xf32>, vector<8x8xf32> -> vector<8x8xf32>
    %c8 = arith.constant 8 : index
    %c0_29 = arith.constant 0 : index
    %51 = vector.load %arg9[%c8, %c0_29] : memref<32x32xf32, #tpu.memory_space<vmem>>, vector<8x32xf32>
    %cst_30 = arith.constant dense<0.000000e+00> : vector<8x32xf32>
    %52 = tpu.matmul %50, %51, %cst_30 {dimension_numbers = #tpu.dot_dimension_numbers<[1], [0], [0], [1], [0, 0, 1, 1], [], []>} : vector<8x8xf32>, vector<8x32xf32>, vector<8x32xf32> -> vector<8x32xf32>
    %53 = arith.addf %35, %52 : vector<8x32xf32>
    %54 = vector.extract_strided_slice %6 {offsets = [0, 16], sizes = [8, 8], strides = [1, 1]} : vector<8x32xf32> to vector<8x8xf32>
    %55 = vector.extract_strided_slice %11 {offsets = [0, 16], sizes = [8, 8], strides = [1, 1]} : vector<8x32xf32> to vector<8x8xf32>
    %56 = vector.extract_strided_slice %16 {offsets = [0, 16], sizes = [8, 8], strides = [1, 1]} : vector<8x32xf32> to vector<8x8xf32>
    %cst_31 = arith.constant dense<0.000000e+00> : vector<8x8xf32>
    %57 = tpu.matmul %54, %55, %cst_31 {dimension_numbers = #tpu.dot_dimension_numbers<[1], [1], [0], [0], [0, 0, 1, 0], [], []>} : vector<8x8xf32>, vector<8x8xf32>, vector<8x8xf32> -> vector<8x8xf32>
    %cst_32 = arith.constant dense<0xFF800000> : vector<8xf32>
    %58 = vector.multi_reduction <maximumf>, %57, %cst_32 [1] : vector<8x8xf32> to vector<8xf32>
    %59 = vector.shape_cast %58 : vector<8xf32> to vector<8x1xf32>
    %60 = vector.broadcast %59 : vector<8x1xf32> to vector<8x8xf32>
    %61 = arith.subf %57, %60 : vector<8x8xf32>
    %62 = math.exp %61 : vector<8x8xf32>
    %cst_33 = arith.constant dense<0.000000e+00> : vector<8xf32>
    %63 = vector.multi_reduction <add>, %62, %cst_33 [1] : vector<8x8xf32> to vector<8xf32>
    %64 = vector.shape_cast %63 : vector<8xf32> to vector<8x1xf32>
    %65 = tpu.reciprocal %64 {approx = true} : vector<8x1xf32> -> vector<8x1xf32>
    %66 = vector.broadcast %65 : vector<8x1xf32> to vector<8x8xf32>
    %67 = arith.mulf %62, %66 : vector<8x8xf32>
    %cst_34 = arith.constant dense<0.000000e+00> : vector<8x8xf32>
    %68 = tpu.matmul %67, %56, %cst_34 {dimension_numbers = #tpu.dot_dimension_numbers<[1], [0], [0], [1], [0, 0, 1, 1], [], []>} : vector<8x8xf32>, vector<8x8xf32>, vector<8x8xf32> -> vector<8x8xf32>
    %c16 = arith.constant 16 : index
    %c0_35 = arith.constant 0 : index
    %69 = vector.load %arg9[%c16, %c0_35] : memref<32x32xf32, #tpu.memory_space<vmem>>, vector<8x32xf32>
    %cst_36 = arith.constant dense<0.000000e+00> : vector<8x32xf32>
    %70 = tpu.matmul %68, %69, %cst_36 {dimension_numbers = #tpu.dot_dimension_numbers<[1], [0], [0], [1], [0, 0, 1, 1], [], []>} : vector<8x8xf32>, vector<8x32xf32>, vector<8x32xf32> -> vector<8x32xf32>
    %71 = arith.addf %53, %70 : vector<8x32xf32>
    %72 = vector.extract_strided_slice %6 {offsets = [0, 24], sizes = [8, 8], strides = [1, 1]} : vector<8x32xf32> to vector<8x8xf32>
    %73 = vector.extract_strided_slice %11 {offsets = [0, 24], sizes = [8, 8], strides = [1, 1]} : vector<8x32xf32> to vector<8x8xf32>
    %74 = vector.extract_strided_slice %16 {offsets = [0, 24], sizes = [8, 8], strides = [1, 1]} : vector<8x32xf32> to vector<8x8xf32>
    %cst_37 = arith.constant dense<0.000000e+00> : vector<8x8xf32>
    %75 = tpu.matmul %72, %73, %cst_37 {dimension_numbers = #tpu.dot_dimension_numbers<[1], [1], [0], [0], [0, 0, 1, 0], [], []>} : vector<8x8xf32>, vector<8x8xf32>, vector<8x8xf32> -> vector<8x8xf32>
    %cst_38 = arith.constant dense<0xFF800000> : vector<8xf32>
    %76 = vector.multi_reduction <maximumf>, %75, %cst_38 [1] : vector<8x8xf32> to vector<8xf32>
    %77 = vector.shape_cast %76 : vector<8xf32> to vector<8x1xf32>
    %78 = vector.broadcast %77 : vector<8x1xf32> to vector<8x8xf32>
    %79 = arith.subf %75, %78 : vector<8x8xf32>
    %80 = math.exp %79 : vector<8x8xf32>
    %cst_39 = arith.constant dense<0.000000e+00> : vector<8xf32>
    %81 = vector.multi_reduction <add>, %80, %cst_39 [1] : vector<8x8xf32> to vector<8xf32>
    %82 = vector.shape_cast %81 : vector<8xf32> to vector<8x1xf32>
    %83 = tpu.reciprocal %82 {approx = true} : vector<8x1xf32> -> vector<8x1xf32>
    %84 = vector.broadcast %83 : vector<8x1xf32> to vector<8x8xf32>
    %85 = arith.mulf %80, %84 : vector<8x8xf32>
    %cst_40 = arith.constant dense<0.000000e+00> : vector<8x8xf32>
    %86 = tpu.matmul %85, %74, %cst_40 {dimension_numbers = #tpu.dot_dimension_numbers<[1], [0], [0], [1], [0, 0, 1, 1], [], []>} : vector<8x8xf32>, vector<8x8xf32>, vector<8x8xf32> -> vector<8x8xf32>
    %c24 = arith.constant 24 : index
    %c0_41 = arith.constant 0 : index
    %87 = vector.load %arg9[%c24, %c0_41] : memref<32x32xf32, #tpu.memory_space<vmem>>, vector<8x32xf32>
    %cst_42 = arith.constant dense<0.000000e+00> : vector<8x32xf32>
    %88 = tpu.matmul %86, %87, %cst_42 {dimension_numbers = #tpu.dot_dimension_numbers<[1], [0], [0], [1], [0, 0, 1, 1], [], []>} : vector<8x8xf32>, vector<8x32xf32>, vector<8x32xf32> -> vector<8x32xf32>
    %89 = arith.addf %71, %88 : vector<8x32xf32>
    %c0_43 = arith.constant 0 : index
    %c0_44 = arith.constant 0 : index
    %90 = vector.load %arg10[%c0_43, %c0_44] : memref<1x32xf32, #tpu.memory_space<vmem>>, vector<1x32xf32>
    %91 = vector.broadcast %90 : vector<1x32xf32> to vector<8x32xf32>
    %92 = arith.addf %89, %91 : vector<8x32xf32>
    %c0_45 = arith.constant 0 : index
    %c0_46 = arith.constant 0 : index
    %93 = vector.load %arg11[%c0_45, %c0_46] : memref<8x32xf32, #tpu.memory_space<vmem>>, vector<8x32xf32>
    tpu.vector_store %arg11[%c0_45, %c0_46], %92 {strides = array<i32>} : memref<8x32xf32, #tpu.memory_space<vmem>>, vector<8x32xf32>,
    return
  }
  func.func @transform_0(%arg0: i32) -> (i32, i32) {
    %c0_i32 = arith.constant 0 : i32
    %c0_i32_0 = arith.constant 0 : i32
    return %arg0, %c0_i32 : i32, i32
  }
  func.func @transform_1(%arg0: i32) -> (i32, i32) {
    %c0_i32 = arith.constant 0 : i32
    %c0_i32_0 = arith.constant 0 : i32
    return %arg0, %c0_i32 : i32, i32
  }
  func.func @transform_2(%arg0: i32) -> (i32, i32) {
    %c0_i32 = arith.constant 0 : i32
    %c0_i32_0 = arith.constant 0 : i32
    %c0_i32_1 = arith.constant 0 : i32
    return %c0_i32, %c0_i32_0 : i32, i32
  }
  func.func @transform_3(%arg0: i32) -> (i32, i32) {
    %c0_i32 = arith.constant 0 : i32
    %c0_i32_0 = arith.constant 0 : i32
    %c0_i32_1 = arith.constant 0 : i32
    return %c0_i32, %c0_i32_0 : i32, i32
  }
  func.func @transform_4(%arg0: i32) -> (i32, i32) {
    %c0_i32 = arith.constant 0 : i32
    %c0_i32_0 = arith.constant 0 : i32
    %c0_i32_1 = arith.constant 0 : i32
    return %c0_i32, %c0_i32_0 : i32, i32
  }
  func.func @transform_5(%arg0: i32) -> (i32, i32) {
    %c0_i32 = arith.constant 0 : i32
    %c0_i32_0 = arith.constant 0 : i32
    %c0_i32_1 = arith.constant 0 : i32
    return %c0_i32, %c0_i32_0 : i32, i32
  }
  func.func @transform_6(%arg0: i32) -> (i32, i32) {
    %c0_i32 = arith.constant 0 : i32
    %c0_i32_0 = arith.constant 0 : i32
    %c0_i32_1 = arith.constant 0 : i32
    return %c0_i32, %c0_i32_0 : i32, i32
  }
  func.func @transform_7(%arg0: i32) -> (i32, i32) {
    %c0_i32 = arith.constant 0 : i32
    %c0_i32_0 = arith.constant 0 : i32
    %c0_i32_1 = arith.constant 0 : i32
    return %c0_i32, %c0_i32_0 : i32, i32
  }
  func.func @transform_8(%arg0: i32) -> (i32, i32) {
    %c0_i32 = arith.constant 0 : i32
    %c0_i32_0 = arith.constant 0 : i32
    %c0_i32_1 = arith.constant 0 : i32
    return %c0_i32, %c0_i32_0 : i32, i32
  }
  func.func @transform_9(%arg0: i32) -> (i32, i32) {
    %c0_i32 = arith.constant 0 : i32
    %c0_i32_0 = arith.constant 0 : i32
    %c0_i32_1 = arith.constant 0 : i32
    return %c0_i32, %c0_i32_0 : i32, i32
  }
  func.func @transform_10(%arg0: i32) -> (i32, i32) {
    %c0_i32 = arith.constant 0 : i32
    %c0_i32_0 = arith.constant 0 : i32
    return %arg0, %c0_i32 : i32, i32
  }
}

</mosaic_0001>

<bundles_post_ra>
// kernel: tpu_custom_call.1
= control target key start
LH: loop header
LB: loop body
LE: loop exit
PB: predicated region body
PF: predicated region fallthrough
CT: control target
= control target key end

     0   :  { %s2910_s0 = inlined_call_operand.hbm [shape: f32[16,32], index: 0, kind: input, shape index: {}]   ;;  %s2911_s1 = inlined_call_operand.hbm [shape: f32[16,32], index: 1, kind: input, shape index: {}]   ;;  %s2912_s2 = inlined_call_operand.hbm [shape: f32[32,32], index: 2, kind: input, shape index: {}]   ;;  %s2913_s3 = inlined_call_operand.vmem [shape: f32[1,32], index: 3, kind: input, shape index: {}]   ;;  %s2914_s4 = inlined_call_operand.hbm [shape: f32[32,32], index: 4, kind: input, shape index: {}]   ;;  %s2915_s5 = inlined_call_operand.vmem [shape: f32[1,32], index: 5, kind: input, shape index: {}]   ;;  %s2916_s6 = inlined_call_operand.hbm [shape: f32[32,32], index: 6, kind: input, shape index: {}]   ;;  %s2917_s7 = inlined_call_operand.vmem [shape: f32[1,32], index: 7, kind: input, shape index: {}]   ;;  %s2918_s8 = inlined_call_operand.hbm [shape: f32[32,32], index: 8, kind: input, shape index: {}]   ;;  %s2919_s9 = inlined_call_operand.vmem [shape: f32[1,32], index: 9, kind: input, shape index: {}]   ;;  %s2920_s10 = inlined_call_operand.hbm [shape: f32[16,32], index: 10, kind: output, shape index: {}]  }
   0x1   :  { %2926 = sst [smem:[#allocation21_spill]] %s2912_s2 }
   0x2   :  { %2927 = sst [smem:[#allocation22_spill]] %s2914_s4 }
   0x3   :  { %2928 = sst [smem:[#allocation23_spill]] %s2916_s6 }
   0x4   :  { %2929 = sst [smem:[#allocation24_spill]] %s2918_s8 }
   0x5   :  { %2930 = sst [smem:[#allocation25_spill]] %s2919_s9 }
   0x6   :  { %2931 = sst [smem:[#allocation26_spill]] %s2920_s10 }
   0x7   :  { %15 = vsyncpa [#allocation3], 0 }
   0x8   :  { %17 = vsyncpa [#allocation3 + $0x1], 0 }
   0x9   :  { %18 = vsyncpa [#allocation6], 0 }
   0xa   :  { %20 = vsyncpa [#allocation6 + $0x1], 0 }
   0xb   :  { %21 = vsyncpa [#allocation9], 0 }
   0xc   :  { %22 = vsyncpa [#allocation12], 0 }
   0xd   :  { %23 = vsyncpa [#allocation4], 0 }
   0xe   :  { %25 = vsyncpa [#allocation4 + $0x1], 0  ;;  %s2469_s13 = smov 0   ;;  %s2471_s14 = smov 0  }
   0xf   :  { %s2473_s15 = smov 0   ;;  %s2475_s16 = smov 0  }
  0x10 LB: > { %s2399_s17 = smov [#allocation7]   ;;  %s2490_s19 = sadd.s32 4294967295, %s2397_s16   ;;  %s2397_s16 = sphi %s2475_s16, %s2963_s16   ;;  %s2393_s15 = sphi %s2473_s15, %s2962_s15   ;;  %s2389_s14 = sphi %s2471_s14, %s2961_s14   ;;  %s2385_s13 = sphi %s2469_s13, %s2960_s13  }
  0x11   : > { %s294_s18 = sshll.u32 %s2399_s17, 4  ;;  %p1832_p0 = scmp.ge.s32.totalorder %s2397_s16, 1  ;;  %s2495_s18 = int_to_ptr.vmem [resolvable:$true] %s294_s18 }
  0x12   : > { %p2922_p1 = scmp.eq.s32.totalorder %s2490_s19, 0  ;;  %p282_p2 = scmp.lt.s32.totalorder %s2397_s16, 3 }
  0x13   : > { %s2400_s21 = smov [#allocation8]   ;;  %s2401_s24 = smov [#allocation10]  }
  0x14   : > { %p2497_p3 = pnand %p1832_p0, %p282_p2  ;;  %s310_s22 = sshll.u32 %s2400_s21, 4  ;;  %s2510_s22 = int_to_ptr.vmem [resolvable:$true] %s310_s22 }
  0x15   : > { %s326_s25 = sshll.u32 %s2401_s24, 4  ;;  %s2934_s2 = sld [smem:[#allocation21_spill]]  ;;  %s2512_s25 = int_to_ptr.vmem [resolvable:$true] %s326_s25 }
  0x16   : > { %s2932_s20 = scalar_select %p2497_p3, 1, 0 }
  0x17   : > { %p2049_p5 = pneg %p2497_p3 }
  0x19   : > { %p2506_p6 = pnand %p2049_p5, %p2922_p1 }
  0x1b   : > { %s2143_s28 = scalar_lea.hbm %s2934_s2, 512  ;;  %p2522_p8 = pneg %p2506_p6 }
  0x1c   : > { %p2144_p7 = scmp.ne.s32.totalorder %s2934_s2, %s2143_s28  ;;  %p2150_p11 = scmp.lt.u32.totalorder %s2143_s28, %s2934_s2 }
  0x1e   : > { %p2146_p9 = pnand %p2522_p8, %p2144_p7 }
  0x20   : > { %p2147_p10 = pneg %p2146_p9 }
  0x22   : > { %p2152_p12 = pnand %p2150_p11, %p2147_p10 }
  0x24   : > { %2155 = shalt.err (!%p2152_p12)
}
  0x25   : > { %s2156_s21 = scalar_lea.vmem %s2495_s18, 512  ;;  %p2164_p5 = scmp.lt.s32.totalorder %s2495_s18, %s2495_s18 }
  0x26   : > { %p2157_p13 = scmp.ne.s32.totalorder %s2495_s18, %s2156_s21  ;;  %p2165_p4 = scmp.lt.s32.totalorder %s2156_s21, %s2156_s21 }
  0x28   : > { %p2159_p0 = pnand %p2157_p13, %p2522_p8  ;;  %p2166_p7 = por %p2165_p4, %p2164_p5 }
  0x2a   : > { %p2160_p2 = pneg %p2159_p0 }
  0x2c   : > { %p2167_p9 = pnand %p2166_p7, %p2160_p2 }
  0x2e   : > { %2170 = shalt.err (!%p2167_p9)
}
  0x2f   : > { %s2402_s24 = smov 128   ;;  %s2403_s26 = smov 8  }
  0x30   : > { %2052 = dma.hbm_to_vmem [thread:$0]  (!%p2506_p6), %s2934_s2, 512, %s2495_s18, [#allocation6], %s2402_s24, %s2402_s24, %s2403_s26  }
  0x31   : > { %s2936_s4 = sld [smem:[#allocation22_spill]] }
  0x37   : > { %s2171_s12 = scalar_lea.hbm %s2936_s4, 512 }
  0x38   : > { %p2172_p4 = scmp.ne.s32.totalorder %s2936_s4, %s2171_s12  ;;  %p2178_p12 = scmp.lt.u32.totalorder %s2171_s12, %s2936_s4 }
  0x3a   : > { %p2174_p10 = pnand %p2172_p4, %p2522_p8 }
  0x3c   : > { %p2175_p11 = pneg %p2174_p10 }
  0x3e   : > { %p2180_p13 = pnand %p2178_p12, %p2175_p11 }
  0x40   : > { %2183 = shalt.err (!%p2180_p13)
}
  0x41   : > { %s2184_s18 = scalar_lea.vmem %s2510_s22, 512  ;;  %p2192_p7 = scmp.lt.s32.totalorder %s2510_s22, %s2510_s22 }
  0x42   : > { %p2185_p0 = scmp.ne.s32.totalorder %s2510_s22, %s2184_s18  ;;  %p2193_p9 = scmp.lt.s32.totalorder %s2184_s18, %s2184_s18 }
  0x44   : > { %p2187_p2 = pnand %p2185_p0, %p2522_p8  ;;  %p2194_p4 = por %p2193_p9, %p2192_p7 }
  0x46   : > { %p2188_p5 = pneg %p2187_p2 }
  0x48   : > { %p2195_p10 = pnand %p2194_p4, %p2188_p5 }
  0x4a   : > { %2198 = shalt.err (!%p2195_p10)
}
  0x4b   : > { %2055 = dma.hbm_to_vmem [thread:$0]  (!%p2506_p6), %s2936_s4, 512, %s2510_s22, [#allocation9], %s2402_s24, %s2402_s24, %s2403_s26  }
  0x4c   : > { %s2937_s6 = sld [smem:[#allocation23_spill]] }
  0x52   : > { %s2199_s29 = scalar_lea.hbm %s2937_s6, 512 }
  0x53   : > { %p2200_p11 = scmp.ne.s32.totalorder %s2937_s6, %s2199_s29  ;;  %p2206_p0 = scmp.lt.u32.totalorder %s2199_s29, %s2937_s6 }
  0x55   : > { %p2202_p12 = pnand %p2200_p11, %p2522_p8 }
  0x57   : > { %p2203_p13 = pneg %p2202_p12 }
  0x59   : > { %p2208_p2 = pnand %p2206_p0, %p2203_p13 }
  0x5b   : > { %2211 = shalt.err (!%p2208_p2)
}
  0x5c   : > { %s2212_s22 = scalar_lea.vmem %s2512_s25, 512  ;;  %p2220_p4 = scmp.lt.s32.totalorder %s2512_s25, %s2512_s25 }
  0x5d   : > { %p2213_p5 = scmp.ne.s32.totalorder %s2512_s25, %s2212_s22  ;;  %p2221_p10 = scmp.lt.s32.totalorder %s2212_s22, %s2212_s22 }
  0x5f   : > { %p2215_p7 = pnand %p2213_p5, %p2522_p8  ;;  %p2222_p11 = por %p2221_p10, %p2220_p4 }
  0x61   : > { %p2216_p9 = pneg %p2215_p7 }
  0x63   : > { %p2223_p12 = pnand %p2222_p11, %p2216_p9 }
  0x65   : > { %2226 = shalt.err (!%p2223_p12)
}
  0x66   : > { %2058 = dma.hbm_to_vmem [thread:$0]  (!%p2506_p6), %s2937_s6, 512, %s2512_s25, [#allocation9], %s2402_s24, %s2402_s24, %s2403_s26  }
  0x67   : > { %s2404_s10 = smov [#allocation11]   ;;  %s2938_s8 = sld [smem:[#allocation24_spill]] }
  0x68   : > { %s342_s27 = sshll.u32 %s2404_s10, 4  ;;  %s343_s27 = int_to_ptr.vmem [resolvable:$true] %s342_s27 }
  0x6d   : > { %s2227_s30 = scalar_lea.hbm %s2938_s8, 512 }
  0x6e   : > { %p2228_p13 = scmp.ne.s32.totalorder %s2938_s8, %s2227_s30  ;;  %p2234_p5 = scmp.lt.u32.totalorder %s2227_s30, %s2938_s8 }
  0x70   : > { %p2230_p0 = pnand %p2228_p13, %p2522_p8 }
  0x72   : > { %p2231_p2 = pneg %p2230_p0 }
  0x74   : > { %p2236_p7 = pnand %p2234_p5, %p2231_p2 }
  0x76   : > { %2239 = shalt.err (!%p2236_p7)
}
  0x77   : > { %s2240_s25 = scalar_lea.vmem %s343_s27, 512  ;;  %p2248_p11 = scmp.lt.s32.totalorder %s343_s27, %s343_s27 }
  0x78   : > { %p2241_p9 = scmp.ne.s32.totalorder %s343_s27, %s2240_s25  ;;  %p2249_p12 = scmp.lt.s32.totalorder %s2240_s25, %s2240_s25 }
  0x7a   : > { %p2243_p4 = pnand %p2241_p9, %p2522_p8  ;;  %p2250_p1 = por %p2249_p12, %p2248_p11 }
  0x7c   : > { %p2244_p10 = pneg %p2243_p4 }
  0x7e   : > { %p2251_p3 = pnand %p2250_p1, %p2244_p10 }
  0x80   : > { %2254 = shalt.err (!%p2251_p3)
}
  0x81   : > { %2061 = dma.hbm_to_vmem [thread:$0]  (!%p2506_p6), %s2938_s8, 512, %s343_s27, [#allocation12], %s2402_s24, %s2402_s24, %s2403_s26  }
  0x82   : > { %s1831_s23 = sadd.s32 4294967294, %s2397_s16   ;;  %s2621_s11 = sadd.s32 1, %s2397_s16  }
  0x83   : > { %s35_s10 = ssub.s32 %s2397_s16, %s2621_s11  ;;  %s38_s28 = sadd.s32 1, %s2393_s15 }
  0x84   : > { %p36_p1 = scmp.eq.s32.totalorder %s35_s10, 0  ;;  %p45_p3 = scmp.ne.s32.totalorder %s2393_s15, %s2389_s14 }
  0x85   : > { %p46_p8 = scmp.eq.s32.totalorder %s2397_s16, 0  ;;  %p51_p13 = scmp.ne.s32.totalorder %s2389_s14, %s2385_s13 }
  0x86   : > { %s2632_s29 = scalar_select %p36_p1, %s2393_s15, %s38_s28  }
  0x87   : > { %p2634_p0 = por %p46_p8, %p45_p3  ;;  %p2941_p2 = scmp.eq.s32.totalorder %s2490_s19, 0 }
  0x88   : > { %2939 = sst [smem:[#allocation20_spill]] %s2632_s29  ;;  %p269_p5 = scmp.eq.s32.totalorder %s2490_s19, 1 }
  0x89   : > { %p2640_p6 = por %p2941_p2, %p51_p13  ;;  %p275_p7 = scmp.eq.s32.totalorder %s1831_s23, 1 }
  0x8a   : > { %p2077_p9 = scmp.lt.s32.totalorder %s2397_s16, 2  ;;  %s359_s26 = sand.u32 1, %s2393_s15  }
  0x8b   : > { %s2942_s24 = scalar_select %p2640_p6, 1, 0 }
  0x8c   : > { %p2647_p4 = por %p269_p5, %p45_p3  ;;  %p2651_p10 = por %p275_p7, %p51_p13 }
  0x8d   : > { %s2655_s17 = sshll.u32 %s359_s26, 3  ;;  %s1839_s21 = sshll.u32 %s2397_s16, 7 }
  0x8e   : > { %s2943_s27 = scalar_select %p2647_p4, 1, 0 }
  0x8f   : > { %s2944_s12 = scalar_select %p2651_p10, 1, 0 }
  0x90   : > { %s2661_s18 = scalar_lea.hbm %s2910_s0, %s1839_s21  ;;  %s363_s9 = scalar_lea.vmem [#allocation2], %s2655_s17 }
  0x91   : > { %s370_s23 = sshll.u32 %s363_s9, 4  ;;  %p2668_p11 = pnand %p2077_p9, %p2634_p0  ;;  %s2664_s23 = int_to_ptr.vmem [resolvable:$true] %s370_s23 }
  0x92   : > { %s2675_s22 = scalar_lea.hbm %s2911_s1, %s1839_s21  ;;  %s377_s25 = sand.u32 1, %s2397_s16  }
  0x93   : > { %s360_s4 = scalar_lea.sflag [#allocation3], %s359_s26  ;;  %s2255_s6 = scalar_lea.hbm %s2661_s18, 128 }
  0x94   : > { %p2256_p12 = scmp.ne.s32.totalorder %s2661_s18, %s2255_s6  ;;  %p2257_p1 = pneg %p2668_p11 }
  0x95   : > { %s2260_s8 = scalar_lea.hbm %s2910_s0, 256  ;;  %p2261_p13 = scmp.lt.u32.totalorder %s2661_s18, %s2910_s0 }
  0x96   : > { %p2258_p3 = pnand %p2257_p1, %p2256_p12  ;;  %p2262_p0 = scmp.lt.u32.totalorder %s2260_s8, %s2255_s6 }
  0x97   : > { %p2264_p5 = scmp.lt.u32.totalorder %s2255_s6, %s2661_s18 }
  0x98   : > { %p2259_p8 = pneg %p2258_p3  ;;  %p2263_p2 = por %p2262_p0, %p2261_p13 }
  0x9a   : > { %p2265_p7 = por %p2264_p5, %p2263_p2 }
  0x9c   : > { %p2266_p9 = pnand %p2265_p7, %p2259_p8 }
  0x9e   : > { %2269 = shalt.err (!%p2266_p9)
}
  0x9f   : > { %s2270_s26 = scalar_lea.vmem %s2664_s23, 128  ;;  %s2405_s21 = smov [#allocation2]  }
  0xa0   : > { %p2271_p12 = scmp.ne.s32.totalorder %s2664_s23, %s2270_s26  ;;  %s2275_s28 = sshll.u32 %s2405_s21, 4  ;;  %s2276_s28 = int_to_ptr.vmem [resolvable:$false] %s2275_s28 }
  0xa1   : > { %s2277_s29 = scalar_lea.vmem %s2276_s28, 256  ;;  %p2278_p4 = scmp.lt.s32.totalorder %s2664_s23, %s2276_s28 }
  0xa2   : > { %p2273_p3 = pnand %p2271_p12, %p2257_p1  ;;  %p2279_p13 = scmp.lt.s32.totalorder %s2277_s29, %s2270_s26 }
  0xa4   : > { %p2274_p10 = pneg %p2273_p3  ;;  %p2280_p0 = por %p2279_p13, %p2278_p4 }
  0xa6   : > { %p2281_p2 = pnand %p2280_p0, %p2274_p10 }
  0xa8   : > { %2284 = shalt.err (!%p2281_p2)
}
  0xa9   : > { %2065 = dma.hbm_to_vmem [thread:$0]  (!%p2668_p11), %s2661_s18, 128, %s2664_s23, %s360_s4  }
  0xaa   : > { %s381_s6 = scalar_lea.vmem [#allocation5], %s2655_s17  ;;  %s378_s30 = scalar_lea.sflag [#allocation6], %s377_s25 }
  0xab   : > { %s388_s8 = sshll.u32 %s381_s6, 4  ;;  %s2285_s9 = scalar_lea.hbm %s2675_s22, 128  ;;  %s389_s8 = int_to_ptr.vmem [resolvable:$true] %s388_s8 }
  0xac   : > { %p2286_p4 = scmp.ne.s32.totalorder %s2675_s22, %s2285_s9  ;;  %s2290_s21 = scalar_lea.hbm %s2911_s1, 256 }
  0xad   : > { %p2291_p5 = scmp.lt.u32.totalorder %s2675_s22, %s2911_s1  ;;  %p2292_p7 = scmp.lt.u32.totalorder %s2290_s21, %s2285_s9 }
  0xae   : > { %p2288_p10 = pnand %p2286_p4, %p2257_p1  ;;  %p2294_p12 = scmp.lt.u32.totalorder %s2285_s9, %s2675_s22 }
  0xaf   : > { %p2293_p9 = por %p2292_p7, %p2291_p5 }
  0xb0   : > { %p2289_p8 = pneg %p2288_p10 }
  0xb1   : > { %p2295_p3 = por %p2294_p12, %p2293_p9 }
  0xb3   : > { %p2296_p13 = pnand %p2295_p3, %p2289_p8 }
  0xb5   : > { %2299 = shalt.err (!%p2296_p13)
}
  0xb6   : > { %s2300_s4 = scalar_lea.vmem %s389_s8, 128  ;;  %s2406_s17 = smov [#allocation5]  }
  0xb7   : > { %p2301_p0 = scmp.ne.s32.totalorder %s389_s8, %s2300_s4  ;;  %s2305_s18 = sshll.u32 %s2406_s17, 4  ;;  %s2306_s18 = int_to_ptr.vmem [resolvable:$false] %s2305_s18 }
  0xb8   : > { %s2307_s23 = scalar_lea.vmem %s2306_s18, 256  ;;  %p2308_p10 = scmp.lt.s32.totalorder %s389_s8, %s2306_s18 }
  0xb9   : > { %p2303_p2 = pnand %p2301_p0, %p2257_p1  ;;  %p2309_p6 = scmp.lt.s32.totalorder %s2307_s23, %s2300_s4 }
  0xbb   : > { %p2304_p4 = pneg %p2303_p2  ;;  %p2310_p5 = por %p2309_p6, %p2308_p10 }
  0xbd   : > { %p2311_p7 = pnand %p2310_p5, %p2304_p4 }
  0xbf   : > { %2314 = shalt.err (!%p2311_p7)
}
  0xc0   : > { %2068 = dma.hbm_to_vmem [thread:$0]  (!%p2668_p11), %s2675_s22, 128, %s389_s8, %s378_s30  }
  0xc1   : > { %p2946_p8 = scmp.ne.s32.totalorder %s2932_s20, 0 }
  0xc2   : > { %s2728_s25 = sand.u32 (!%p2946_p8), 1, %s2389_s14   ;;  %p2947_p6 = scmp.ne.s32.totalorder (!%p2946_p8), %s2942_s24, 0 }
  0xc3   : > { %397 = sbr.rel (%p2946_p8) target bundleno = 2800 (0xaf0), region = 60  ;;  %s2731_s6 = sshll.u32 (!%p2946_p8), %s2728_s25, 3 }
  0xc4   : > { %s400_s9 = scalar_lea.sflag (!%p2946_p8), [#allocation3], %s2728_s25  ;;  %s403_s2 = scalar_lea.vmem (!%p2946_p8), [#allocation2], %s2731_s6 }
  0xca   : > { %2360 = dma.done.wait (%p2947_p6), %s400_s9, 128  }
  0xcb   : > { %2362 = vsyncadd (%p2947_p6), %s400_s9, 4294967168  ;;  %s408_s20 = sand.u32 1, %s2490_s19   ;;  %s412_s22 = scalar_lea.vmem [#allocation5], %s2731_s6 }
  0xcc   : > { %s409_s10 = scalar_lea.sflag [#allocation6], %s408_s20 }
  0xcd   : > { %2364 = dma.done.wait (%p2947_p6), %s409_s10, 128  }
  0xce   : > { %2366 = vsyncadd (%p2947_p6), %s409_s10, 4294967168  ;;  %p2948_p11 = scmp.eq.s32.totalorder %s2490_s19, 0 }
  0xd0   : > { %2368 = dma.done.wait (%p2948_p11), [#allocation6], 512   ;;  %p2949_p1 = pmov %p2948_p11 }
  0xd2   : > { %2370 = vsyncadd (%p2949_p1), [#allocation6], 4294966784  ;;  %p2950_p9 = pmov %p2949_p1 }
  0xd3   : > { %p2951_p12 = pmov %p2949_p1 }
  0xd4   : > { %2372 = dma.done.wait (%p2950_p9), [#allocation9], 1024  }
  0xd5   : > { %2374 = vsyncadd (%p2951_p12), [#allocation9], 4294966272  ;;  %p2952_p3 = pmov %p2949_p1 }
  0xd6   : > { %p2953_p13 = pmov %p2949_p1 }
  0xd7   : > { %2376 = dma.done.wait (%p2952_p3), [#allocation12], 512  }
  0xd8   : > { %2378 = vsyncadd (%p2953_p13), [#allocation12], 4294966784  ;;  %v2407_v0 = vmov 0.0|0.0   ;;  %vm2408_vm0 = vmmov 0   ;;  %v2409_v1 = vmov 0.0   ;;  %v557_v2 = vld [vmem:[#allocation8] sm:$0xff] }
  0xd9   : > { %2015 = vmatprep.subr.bf16.mxu1 %v2407_v0  ;;  %2009 = vmatprep.subr.bf16.mxu0 %v2407_v0  ;;  %v558_v3 = vld [vmem:[#allocation8 + $0x8] sm:$0xff]  ;;  %v472_v4 = vld [vmem:[#allocation7] sm:$0xff]  ;;  %v559_v7 = vld [vmem:[#allocation8 + $0x10] sm:$0xff]  ;;  %vm483_vm1 = vcmask 261120   ;;  %vm722_vm2 = vcmask 64512   ;;  %s2410_s21 = smov 120  }
  0xda   : > { %1935 = vmatprep.mubr.msk.f32.mxu1 %vm2408_vm0, %v2409_v1  ;;  %1924 = vmatprep.mubr.msk.f32.mxu0 %vm2408_vm0, %v2409_v1  ;;  %v2016_v5 = vpack.c.bf16 %v558_v3, %v557_v2  ;;  %v473_v6 = vld [vmem:[#allocation7 + $0x8] sm:$0xff]  ;;  %v560_v8 = vld [vmem:[#allocation8 + $0x18] sm:$0xff]  ;;  %v474_v10 = vld [vmem:[#allocation7 + $0x10] sm:$0xff]  ;;  %s2411_s4 = smov 112   ;;  %s2412_s17 = smov 104  }
  0xdb   : > { %v2010_v9 = vpack.c.bf16 %v473_v6, %v472_v4  ;;  %v475_v11 = vld [vmem:[#allocation7 + $0x18] sm:$0xff]  ;;  %v2019_v12 = vpack.c.bf16 %v560_v8, %v559_v7  ;;  %v470_v14 = vld [vmem:[%s403_s2] sm:$0xff]  ;;  %v640_v17 = vld [vmem:[#allocation10 + $0x10] sm:$0xff]  ;;  %s2954_s9 = sld [smem:[#allocation25_spill]]  ;;  %s1874_s2 = sshll.u32 %s2490_s19, 7 }
  0xdc   : > { %2017 = vmatpush3.bf16.msra.mxu1 %v2016_v5  ;;  %v2013_v13 = vpack.c.bf16 %v475_v11, %v474_v10  ;;  %v638_v15 = vld [vmem:[#allocation10] sm:$0xff]  ;;  %v639_v16 = vld [vmem:[#allocation10 + $0x8] sm:$0xff]  ;;  %v641_v19 = vld [vmem:[#allocation10 + $0x18] sm:$0xff]  ;;  %s469_s20 = scalar_lea.vmem [#allocation13], %s2731_s6  ;;  %s2955_s8 = sld [smem:[#allocation26_spill]] }
  0xdd   : > { %2011 = vmatpush3.bf16.msra.mxu0 %v2010_v9  ;;  %2018 = vmatprep.subr.bf16.mxu1 %v2407_v0  ;;  %v2022_v18 = vpack.c.bf16 %v639_v16, %v638_v15  ;;  %v2025_v20 = vpack.c.bf16 %v641_v19, %v640_v17  ;;  %v471_v21 = vld [vmem:[%s412_s22] sm:$0xff]  ;;  %v1852_v22 = vld [vmem:[%s2915_s5] ss:$0 sm:$0xff]  ;;  %v1050_v55 = vld [vmem:[#allocation11 + $0x8] sm:$0xff]  ;;  %s1700_s10 = sshll.u32 %s469_s20, 4  ;;  %s1687_s26 = scalar_lea.sflag [#allocation4], %s2728_s25  ;;  %s2867_s10 = int_to_ptr.vmem [resolvable:$true] %s1700_s10 }
  0xde   : > { %2012 = vmatprep.subr.bf16.mxu0 %v2407_v0  ;;  %v1850_v23 = vld [vmem:[%s2913_s3] ss:$0 sm:$0xff]  ;;  %p2956_p2 = scmp.ne.s32.totalorder %s2943_s27, 0  ;;  %s2413_s19 = smov [#allocation13]  }
  0xdf   : > { %v1854_v32 = vld [vmem:[%s2917_s7] ss:$0 sm:$0xff]  ;;  %s2319_s6 = sshll.u32 %s2413_s19, 4  ;;  %s2320_s6 = int_to_ptr.vmem [resolvable:$false] %s2319_s6 }
  0xe0   : > { %2020 = vmatpush3.bf16.msra.mxu1 %v2019_v12  ;;  %v883_v60 = vld [vmem:[#allocation11] sm:$0xff]  ;;  %s2321_s28 = scalar_lea.vmem %s2320_s6, 256  ;;  %p2322_p5 = scmp.lt.s32.totalorder %s2867_s10, %s2320_s6 }
  0xe1   : > { %2014 = vmatpush3.bf16.msra.mxu0 %v2013_v13  ;;  %1949 = vmatprep.subr.mxu1 %v2409_v1 }
  0xe2   : > { %2021 = vmatprep.subr.bf16.mxu0 %v2407_v0  ;;  %s2865_s30 = scalar_lea.hbm %s2955_s8, %s1874_s2 }
  0xe3   : > { %1936 = vmatmul.mubr.msk.f32.vlgmr.msra.gmra.mrb[0].mxu1 %vm483_vm1, %v470_v14 }
  0xe4   : > { %1925 = vmatmul.mubr.msk.f32.vlgmr.msra.gmra.mrb[0].mxu0 %vm483_vm1, %v470_v14  ;;  %1951 = vmatprep.mubr.msk.f32.mxu1 %vm2408_vm0, %v2409_v1 }
  0xe5   : > { %1946 = vmatprep.mubr.msk.f32.mxu0 %vm2408_vm0, %v2409_v1  ;;  %2023 = vmatpush3.bf16.msra.mxu0 %v2022_v18 }
  0xe6   : > { %2024 = vmatprep.subr.bf16.mxu0 %v2407_v0 }
  0xe9   : > { %2026 = vmatpush3.bf16.msra.mxu0 %v2025_v20 }
  0xea   : > { %1959 = vmatprep.subr.mxu0 %v2409_v1 }
  0xec   : > { %1947 = vmatmul.mubr.msk.f32.vlgmr.msra.gmra.mrb[2].mxu0 %vm483_vm1, %v471_v21 }
  0xed   : > { %1961 = vmatprep.mubr.msk.f32.mxu0 %vm2408_vm0, %v2409_v1 }
 0x1b6   : > { %v634_v24 = vpop.f32.mrb[0].mxu1 }
 0x1b7   : > { %v635_v25 = vadd.f32 %v1852_v22, %v634_v24  ;;  %v1937_v26 = vpop.f32.mrb[1].mxu1  ;;  %v553_v27 = vpop.f32.mrb[0].mxu0 }
 0x1b8   : > { %v2782_v28 = vadd.f32 %v1850_v23, %v553_v27  ;;  %v1926_v29 = vpop.f32.mrb[1].mxu0  ;;  %v1362_v23 = vld [vmem:[#allocation11 + $0x10] sm:$0xff] }
 0x1b9   : > { %886 = vrot.lane.b32.xlu0 %v635_v25, %s2410_s21  ;;  %1950 = vmatpush3.xpose.msk.msra.mxu1 %vm722_vm2, %v635_v25 }
 0x1ba   : > { %1954 = vmatprep.subr.mxu1 %v2409_v1 }
 0x1bc   : > { %1952 = vmatmul.mubr.msk.f32.vlgmr.msra.gmra.mrb[2].mxu1 %vm722_vm2, %v2782_v28 }
 0x1bd   : > { %884 = vrot.lane.b32.xlu0 %v2782_v28, %s2410_s21  ;;  %1956 = vmatprep.mubr.msk.f32.mxu1 %vm2408_vm0, %v2409_v1 }
 0x1bf   : > { %v718_v33 = vpop.f32.mrb[2].mxu0 }
 0x1c0   : > { %v2801_v34 = vadd.f32 %v1854_v32, %v718_v33  ;;  %v1948_v35 = vpop.f32.mrb[3].mxu0 }
 0x1c1   : > { %v1602_v35 = vld [vmem:[#allocation11 + $0x18] sm:$0xff] }
 0x1c2   : > { %1955 = vmatpush3.msra.mxu1 %v2801_v34 }
 0x1c3   : > { %1964 = vmatprep.subr.mxu1 %v2409_v1 }
 0x22b   : > { %v887_v30 = vpop.permute.xlu0 %886 }
 0x22c   : > { %1960 = vmatpush3.xpose.msk.msra.mxu0 %vm722_vm2, %v887_v30 }
 0x22d   : > { %1969 = vmatprep.subr.mxu0 %v2409_v1 }
 0x22f   : > { %v885_v31 = vpop.permute.xlu0 %884 }
 0x230   : > { %1962 = vmatmul.mubr.msk.f32.vlgmr.msra.gmra.mrb[4].mxu0 %vm722_vm2, %v885_v31 }
 0x231   : > { %1971 = vmatprep.mubr.msk.f32.mxu0 %vm2408_vm0, %v2409_v1  ;;  %1970 = vmatpush3.msra.mxu0 %v1050_v55 }
 0x232   : > { %1979 = vmatprep.subr.mxu0 %v2409_v1 }
 0x28f   : > { %v795_v36 = vpop.f32.mrb[2].mxu1 }
 0x290   : > { %v1953_v37 = vpop.f32.mrb[3].mxu1  ;;  %v799_v38 = vsel %vm722_vm2, %v795_v36, -inf }
 0x291   : > { %800 = vmax.xlane.f32.xlu1 %v799_v38 }
 0x303   : > { %v958_v39 = vpop.f32.mrb[4].mxu0 }
 0x304   : > { %v1963_v40 = vpop.f32.mrb[5].mxu0  ;;  %v962_v41 = vsel %vm722_vm2, %v958_v39, -inf }
 0x305   : > { %963 = vmax.xlane.f32.xlu1 %v962_v41 }
 0x31e   : > { %v801_v42 = vpop.xlane.xlu1 %800 }
 0x31f   : > { %v802_v43 = vsub.f32 %v795_v36, %v801_v42 }
 0x321   : > { %v803_v44 = vmul.f32 1.442695, %v802_v43 }
 0x323   : > { %2127 = vpow2.f32 %v803_v44  ;;  %v1872_v44 = vld [vmem:[%s2954_s9] ss:$0 sm:$0xff] }
 0x32d   : > { %v2128_v45 = vpop.eup %2127 }
 0x32e   : > { %v805_v46 = vsel %vm722_vm2, %v2128_v45, 0.0 }
 0x32f   : > { %806 = vadd.xlane.f32.xlu0 %v805_v46 }
 0x345   : > { %1286 = vrot.lane.b32.xlu0 %v2801_v34, %s2411_s4 }
 0x349   : > { %1439 = vrot.lane.b32.xlu0 %v635_v25, %s2412_s17 }
 0x392   : > { %v964_v47 = vpop.xlane.xlu1 %963 }
 0x393   : > { %v965_v48 = vsub.f32 %v958_v39, %v964_v47 }
 0x395   : > { %v966_v49 = vmul.f32 1.442695, %v965_v48 }
 0x397   : > { %2129 = vpow2.f32 %v966_v49 }
 0x3a1   : > { %v2130_v50 = vpop.eup %2129 }
 0x3a2   : > { %v968_v51 = vsel %vm722_vm2, %v2130_v50, 0.0 }
 0x3a3   : > { %969 = vadd.xlane.f32.xlu1 %v968_v51 }
 0x3b4   : > { %974 = vrot.lane.b32.xlu1 %v2801_v34, %s2410_s21  ;;  %s2315_s21 = scalar_lea.vmem %s2867_s10, 128 }
 0x3b5   : > { %p2316_p0 = scmp.ne.s32.totalorder %s2867_s10, %s2315_s21  ;;  %p2323_p7 = scmp.lt.s32.totalorder %s2321_s28, %s2315_s21 }
 0x3b7   : > { %p2317_p4 = pnand %p2316_p0, %p2956_p2  ;;  %p2324_p8 = por %p2323_p7, %p2322_p5 }
 0x3b8   : > { %1199 = vrot.lane.b32.xlu1 %v635_v25, %s2411_s4 }
 0x3b9   : > { %p2318_p10 = pneg %p2317_p4 }
 0x3bb   : > { %p2325_p6 = pnand %p2324_p8, %p2318_p10 }
 0x3bc   : > { %v807_v52 = vpop.xlane.xlu0 %806  ;;  %1197 = vrot.lane.b32.xlu1 %v2782_v28, %s2411_s4 }
 0x3bd   : > { %2131 = vrcp.f32 %v807_v52 }
 0x3c0   : > { %v1287_v62 = vpop.permute.xlu0 %1286 }
 0x3c4   : > { %v1440_v18 = vpop.permute.xlu0 %1439 }
 0x3c7   : > { %v2132_v53 = vpop.eup %2131 }
 0x3c8   : > { %v809_v54 = vmul.f32 %v2132_v53, %v2128_v45 }
 0x3ca   : > { %1957 = vmatmul.mubr.msk.f32.vlgmr.msra.gmra.mrb[4].mxu1 %vm722_vm2, %v809_v54 }
 0x3cb   : > { %1966 = vmatprep.mubr.msk.f32.mxu1 %vm2408_vm0, %v2409_v1 }
 0x430   : > { %v970_v56 = vpop.xlane.xlu1 %969 }
 0x431   : > { %2133 = vrcp.f32 %v970_v56 }
 0x434   : > { %v975_v57 = vpop.permute.xlu1 %974 }
 0x435   : > { %1965 = vmatpush3.msra.mxu1 %v975_v57 }
 0x436   : > { %1974 = vmatprep.subr.mxu1 %v2409_v1 }
 0x438   : > { %v1200_v0 = vpop.permute.xlu1 %1199 }
 0x43b   : > { %v2134_v58 = vpop.eup %2133 }
 0x43c   : > { %v972_v59 = vmul.f32 %v2134_v58, %v2130_v50  ;;  %v1198_v4 = vpop.permute.xlu1 %1197 }
 0x43e   : > { %1967 = vmatmul.mubr.msk.f32.vlgmr.msra.gmra.mrb[6].mxu1 %vm722_vm2, %v972_v59 }
 0x43f   : > { %1975 = vmatpush3.msra.mxu1 %v883_v60  ;;  %1976 = vmatprep.mubr.msk.f32.mxu1 %vm2408_vm0, %v2409_v1 }
 0x440   : > { %1984 = vmatprep.subr.mxu1 %v2409_v1 }
 0x49d   : > { %v879_v61 = vpop.f32.mrb[4].mxu1 }
 0x49e   : > { %v1958_v63 = vpop.f32.mrb[5].mxu1  ;;  %1977 = vmatmul.mubr.msk.f32.vlgmr.msra.gmra.mrb[8].mxu1 %vm722_vm2, %v879_v61 }
 0x49f   : > { %1985 = vmatpush3.msra.mxu1 %v1287_v62  ;;  %1986 = vmatprep.mubr.msk.f32.mxu1 %vm2408_vm0, %v2409_v1 }
 0x4a0   : > { %1994 = vmatprep.subr.mxu1 %v2409_v1 }
 0x511   : > { %v1046_v2 = vpop.f32.mrb[6].mxu1 }
 0x512   : > { %v1968_v3 = vpop.f32.mrb[7].mxu1  ;;  %1972 = vmatmul.mubr.msk.f32.vlgmr.msra.gmra.mrb[6].mxu0 %vm722_vm2, %v1046_v2 }
 0x513   : > { %1980 = vmatpush3.xpose.msk.msra.mxu0 %vm722_vm2, %v1200_v0  ;;  %1981 = vmatprep.mubr.msk.f32.mxu0 %vm2408_vm0, %v2409_v1 }
 0x514   : > { %1989 = vmatprep.subr.mxu0 %v2409_v1 }
 0x516   : > { %1982 = vmatmul.mubr.msk.f32.vlgmr.msra.gmra.mrb[8].mxu0 %vm722_vm2, %v1198_v4 }
 0x517   : > { %1991 = vmatprep.mubr.msk.f32.mxu0 %vm2408_vm0, %v2409_v1  ;;  %1990 = vmatpush3.msra.mxu0 %v1362_v23 }
 0x518   : > { %1999 = vmatprep.subr.mxu0 %v2409_v1 }
 0x571   : > { %v1193_v5 = vpop.f32.mrb[8].mxu1 }
 0x572   : > { %v1978_v6 = vpop.f32.mrb[9].mxu1 }
 0x5e5   : > { %v1120_v7 = vpop.f32.mrb[6].mxu0 }
 0x5e6   : > { %v1194_v8 = vadd.f32 %v1193_v5, %v1120_v7  ;;  %v1973_v9 = vpop.f32.mrb[7].mxu0 }
 0x5e9   : > { %v1271_v10 = vpop.f32.mrb[8].mxu0 }
 0x5ea   : > { %v1983_v11 = vpop.f32.mrb[9].mxu0  ;;  %v1275_v12 = vsel %vm722_vm2, %v1271_v10, -inf }
 0x5eb   : > { %1276 = vmax.xlane.f32.xlu1 %v1275_v12 }
 0x678   : > { %v1277_v13 = vpop.xlane.xlu1 %1276 }
 0x679   : > { %v1278_v14 = vsub.f32 %v1271_v10, %v1277_v13 }
 0x67b   : > { %v1279_v15 = vmul.f32 1.442695, %v1278_v14 }
 0x67d   : > { %2135 = vpow2.f32 %v1279_v15 }
 0x687   : > { %v2136_v16 = vpop.eup %2135 }
 0x688   : > { %v1281_v17 = vsel %vm722_vm2, %v2136_v16, 0.0 }
 0x689   : > { %1282 = vadd.xlane.f32.xlu0 %v1281_v17 }
 0x69f   : > { %1437 = vrot.lane.b32.xlu0 %v2782_v28, %s2412_s17 }
 0x716   : > { %v1283_v19 = vpop.xlane.xlu0 %1282 }
 0x717   : > { %2137 = vrcp.f32 %v1283_v19 }
 0x71a   : > { %v1438_v22 = vpop.permute.xlu0 %1437 }
 0x721   : > { %v2138_v20 = vpop.eup %2137 }
 0x722   : > { %v1285_v21 = vmul.f32 %v2138_v20, %v2136_v16 }
 0x724   : > { %1987 = vmatmul.mubr.msk.f32.vlgmr.msra.gmra.mrb[10].mxu1 %vm722_vm2, %v1285_v21 }
 0x725   : > { %1995 = vmatpush3.xpose.msk.msra.mxu1 %vm722_vm2, %v1440_v18  ;;  %1996 = vmatprep.mubr.msk.f32.mxu1 %vm2408_vm0, %v2409_v1 }
 0x726   : > { %2004 = vmatprep.subr.mxu1 %v2409_v1 }
 0x728   : > { %1997 = vmatmul.mubr.msk.f32.vlgmr.msra.gmra.mrb[12].mxu1 %vm722_vm2, %v1438_v22 }
 0x729   : > { %2006 = vmatprep.mubr.msk.f32.mxu1 %vm2408_vm0, %v2409_v1  ;;  %2005 = vmatpush3.msra.mxu1 %v1602_v35 }
 0x7f7   : > { %v1358_v24 = vpop.f32.mrb[10].mxu1 }
 0x7f8   : > { %v1988_v25 = vpop.f32.mrb[11].mxu1  ;;  %1992 = vmatmul.mubr.msk.f32.vlgmr.msra.gmra.mrb[10].mxu0 %vm722_vm2, %v1358_v24 }
 0x7f9   : > { %2001 = vmatprep.mubr.msk.f32.mxu0 %vm2408_vm0, %v2409_v1 }
 0x7fb   : > { %v1511_v26 = vpop.f32.mrb[12].mxu1 }
 0x7fc   : > { %v1998_v27 = vpop.f32.mrb[13].mxu1  ;;  %v1515_v28 = vsel %vm722_vm2, %v1511_v26, -inf }
 0x7fd   : > { %1516 = vmax.xlane.f32.xlu0 %v1515_v28 }
 0x88a   : > { %v1517_v29 = vpop.xlane.xlu0 %1516 }
 0x88b   : > { %v1518_v30 = vsub.f32 %v1511_v26, %v1517_v29 }
 0x88d   : > { %v1519_v31 = vmul.f32 1.442695, %v1518_v30 }
 0x88f   : > { %2139 = vpow2.f32 %v1519_v31 }
 0x899   : > { %v2140_v32 = vpop.eup %2139 }
 0x89a   : > { %v1521_v33 = vsel %vm722_vm2, %v2140_v32, 0.0 }
 0x89b   : > { %1522 = vadd.xlane.f32.xlu1 %v1521_v33 }
 0x8ac   : > { %1526 = vrot.lane.b32.xlu1 %v2801_v34, %s2412_s17 }
 0x8cb   : > { %v1432_v1 = vpop.f32.mrb[10].mxu0 }
 0x8cc   : > { %v1436_v36 = vadd.f32 %v1432_v1, %v1194_v8  ;;  %v1993_v37 = vpop.f32.mrb[11].mxu0 }
 0x928   : > { %v1523_v38 = vpop.xlane.xlu1 %1522 }
 0x929   : > { %2141 = vrcp.f32 %v1523_v38 }
 0x92c   : > { %v1527_v39 = vpop.permute.xlu1 %1526 }
 0x92d   : > { %2000 = vmatpush3.msra.mxu0 %v1527_v39 }
 0x933   : > { %v2142_v40 = vpop.eup %2141 }
 0x934   : > { %v1525_v41 = vmul.f32 %v2142_v40, %v2140_v32 }
 0x936   : > { %2002 = vmatmul.mubr.msk.f32.vlgmr.msra.gmra.mrb[12].mxu0 %vm722_vm2, %v1525_v41 }
 0xa09   : > { %v1598_v42 = vpop.f32.mrb[12].mxu0 }
 0xa0a   : > { %v2003_v43 = vpop.f32.mrb[13].mxu0  ;;  %2007 = vmatmul.mubr.msk.f32.vlgmr.msra.gmra.mrb[14].mxu1 %vm722_vm2, %v1598_v42 }
 0xadd   : > { %v1672_v34 = vpop.f32.mrb[14].mxu1 }
 0xade   : > { %v1676_v45 = vadd.f32 %v1672_v34, %v1436_v36  ;;  %v2008_v46 = vpop.f32.mrb[15].mxu1 }
 0xae0   : > { %v1684_v47 = vadd.f32 %v1872_v44, %v1676_v45 }
 0xae2   : > { %1685 = vst.msk [vmem:[%s469_s20] sm:$0xff] %vm483_vm1, %v1684_v47 }
 0xae3   : > { %2328 = shalt.err (!%p2325_p6)
}
 0xae4   : > { %s2329_s25 = scalar_lea.hbm %s2865_s30, 128  ;;  %s2333_s17 = scalar_lea.hbm %s2955_s8, 256 }
 0xae5   : > { %p2330_p11 = scmp.ne.s32.totalorder %s2865_s30, %s2329_s25  ;;  %p2334_p12 = scmp.lt.u32.totalorder %s2865_s30, %s2955_s8 }
 0xae6   : > { %p2335_p3 = scmp.lt.u32.totalorder %s2333_s17, %s2329_s25  ;;  %p2337_p0 = scmp.lt.u32.totalorder %s2329_s25, %s2865_s30 }
 0xae7   : > { %p2331_p1 = pnand %p2330_p11, %p2956_p2 }
 0xae8   : > { %p2336_p13 = por %p2335_p3, %p2334_p12 }
 0xae9   : > { %p2332_p9 = pneg %p2331_p1 }
 0xaea   : > { %p2338_p4 = por %p2337_p0, %p2336_p13 }
 0xaec   : > { %p2339_p10 = pnand %p2338_p4, %p2332_p9 }
 0xaee   : > { %2342 = shalt.err (!%p2339_p10)
}
 0xaef   : > { %2047 = dma.vmem_to_hbm [thread:$0]  (%p2956_p2), %s2867_s10, 128, %s2865_s30, %s1687_s26  }
 0xaf0 PF: > { %s1712_s9 = sand.u32 1, %s2385_s13   ;;  %p2957_p5 = scmp.ne.s32.totalorder %s2944_s12, 0 }
 0xaf1   : > { %p2958_p7 = scmp.ge.s32.totalorder %s2397_s16, 2  ;;  %s1713_s2 = scalar_lea.sflag [#allocation4], %s1712_s9 }
 0xaf3   : > { %p2070_p8 = pnand %p2958_p7, %p2957_p5 }
 0xaf5   : > { %2380 = dma.done.wait (!%p2070_p8), %s1713_s2, 128  }
 0xaf6   : > { %2382 = vsyncadd (!%p2070_p8), %s1713_s2, 4294967168  ;;  %s2959_s20 = sld [smem:[#allocation20_spill]]  ;;  %p28_p6 = scmp.ge.s32.totalorder %s2621_s11, 4  }
 0xaf7   : > { %s2960_s13 = smov %s2389_s14  ;;  %s2961_s14 = smov %s2393_s15 }
 0xaf8   : > { %s2963_s16 = smov %s2621_s11  ;;  %30 = sbr.rel (!%p28_p6) target bundleno = 16 (0x10), region = 134 }
 0xafc   : > { %s2962_s15 = smov %s2959_s20 }
 0xaff   :  { %1718 = vsyncpa [#allocation3], 1 }
 0xb00   :  { %1720 = vsyncpa [#allocation3 + $0x1], 1 }
 0xb01   :  { %1721 = vsyncpa [#allocation6], 1 }
 0xb02   :  { %1723 = vsyncpa [#allocation6 + $0x1], 1 }
 0xb03   :  { %1724 = vsyncpa [#allocation9], 1 }
 0xb04   :  { %1725 = vsyncpa [#allocation12], 1 }
 0xb05   :  { %1726 = vsyncpa [#allocation4], 1 }
 0xb06   :  { %1728 = vsyncpa [#allocation4 + $0x1], 1 }

</bundles_post_ra>
